<compile_context>
chip_gen: v6e
topology: v6e:2x2x1
jax: 0.10.0
libtpu: 0.0.40
codegen_flags: <defaults>
</compile_context>

<pallas_src>
import functools

import jax
import jax.numpy as jnp
from jax import lax
from jax.experimental import pallas as pl
from jax.experimental.pallas import tpu as pltpu


def _round_up(x, m):
    return (x + m - 1) // m * m


def _pad_to(a, shape):
    return jnp.pad(a, [(0, s - d) for d, s in zip(a.shape, shape)])


def _pick_tile(n, candidates=(512, 256, 128)):
    """Largest lane-aligned tile that divides n (n is a multiple of 128)."""
    for c in candidates:
        if n % c == 0:
            return c
    return n


def _pick_b_blk(bp, target=256):
    """Batch rows per recurrent grid step.

    Fill the MXU row dimension (up to `target`) while keeping >= 2 programs on
    the parallel batch axis when the batch allows, so the second TensorCore on
    v7x actually engages on the serial recurrence.
    """
    half = _round_up(max(bp // 2, 8), 8)
    return int(min(target, half))


# ---------------------------------------------------------------------------
# Dense kernel:  out = x @ w + b   (casts ride the VPU inside the kernel)
# Used for the hoisted input projection and the hoisted final Linear.
# ---------------------------------------------------------------------------
def _dense_kernel(x_ref, w_ref, b_ref, o_ref, *, compute_dtype):
    x = x_ref[...].astype(compute_dtype)
    w = w_ref[...].astype(compute_dtype)
    o_ref[...] = (jnp.dot(x, w, preferred_element_type=jnp.float32)
                  + b_ref[...]).astype(o_ref.dtype)


def _dense(x2d, w, b2d, *, compute_dtype, out_dtype, tm=512):
    """x2d: (M, K), w: (K, N) [compute dtype], b2d: (1, N) f32 -> (M, N)."""
    M, K = x2d.shape
    N = w.shape[1]
    if M <= tm:
        TM, Mp = M, M
    else:
        TM = tm
        Mp = _round_up(M, TM)
        if Mp != M:
            x2d = _pad_to(x2d, (Mp, K))
    TN = _pick_tile(N)
    out = pl.pallas_call(
        functools.partial(_dense_kernel, compute_dtype=compute_dtype),
        out_shape=jax.ShapeDtypeStruct((Mp, N), out_dtype),
        grid_spec=pltpu.PrefetchScalarGridSpec(
            num_scalar_prefetch=0,
            grid=(Mp // TM, N // TN),
            in_specs=[
                pl.BlockSpec((TM, K), lambda i, j: (i, 0)),
                pl.BlockSpec((K, TN), lambda i, j: (0, j)),
                pl.BlockSpec((1, TN), lambda i, j: (0, j)),
            ],
            out_specs=pl.BlockSpec((TM, TN), lambda i, j: (i, j)),
        ),
        compiler_params=pltpu.CompilerParams(
            dimension_semantics=("parallel", "parallel")),
    )(x2d, w, b2d)
    return out[:M]


# ---------------------------------------------------------------------------
# Recurrent kernel: only the serial part of the LSTM.
# ---------------------------------------------------------------------------
def _lstm_recurrent_kernel(pg_ref, w_hh_ref, h_seq_ref, h_scr, c_scr, *,
                           hidden, unroll):
    Hp = hidden
    T = pg_ref.shape[0]

    # h0 / c0 = 0 (PyTorch default) at the first sequence chunk.
    @pl.when(pl.program_id(1) == 0)
    def _():
        h_scr[...] = jnp.zeros_like(h_scr)
        c_scr[...] = jnp.zeros_like(c_scr)

    w_hh = w_hh_ref[...]                      # (Hp, 4Hp), compute dtype

    def step(t, carry):
        h_prev, c_prev = carry                # f32 (B_blk, Hp)
        # Only the recurrent matmul sits on the serial path; input projection
        # and biases are already folded into pg_ref (stored in compute dtype).
        gates = (pg_ref[t].astype(jnp.float32)
                 + jnp.dot(h_prev.astype(w_hh.dtype), w_hh,
                           preferred_element_type=jnp.float32))
        i_g = jax.nn.sigmoid(gates[:, 0 * Hp:1 * Hp])
        f_g = jax.nn.sigmoid(gates[:, 1 * Hp:2 * Hp])
        g_g = jnp.tanh(gates[:, 2 * Hp:3 * Hp])
        o_g = jax.nn.sigmoid(gates[:, 3 * Hp:4 * Hp])
        c_new = f_g * c_prev + i_g * g_g
        h_new = o_g * jnp.tanh(c_new)
        h_seq_ref[t] = h_new.astype(h_seq_ref.dtype)   # lane-dense store
        return h_new, c_new

    h_last, c_last = lax.fori_loop(0, T, step, (h_scr[...], c_scr[...]),
                                   unroll=unroll)
    h_scr[...] = h_last
    c_scr[...] = c_last


def lstm_rnn_forward(x, w_ih, w_hh, b_ih, b_hh, w_fc, b_fc, *,
                     compute_dtype=jnp.bfloat16, seq_chunk=32):
    """LstmRNN forward.  x: (S, B, I) f32 -> (S, B, O) f32.

    Parameters use PyTorch shapes: w_ih (4H, I), w_hh (4H, H),
    b_ih / b_hh (4H,), w_fc (O, H), b_fc (O,).  Gate order i, f, g, o.
    compute_dtype is the MXU-operand / intermediate-storage dtype (bf16 runs
    full rate on v5e/v6e/v7x MXUs; gate math stays f32 regardless).
    """
    S, B, I = x.shape
    H = w_hh.shape[1]
    O = w_fc.shape[0]
    f32 = jnp.float32

    Hp = _round_up(H, 128)
    Op = _round_up(O, 128)
    Bp = _round_up(B, 8)
    B_BLK = _pick_b_blk(Bp)
    Bp = _round_up(Bp, B_BLK)
    T = min(seq_chunk, S)
    Sp = _round_up(S, T)

    # --- repack weights: per-gate zero-pad H -> Hp, pre-transpose, one cast --
    w_ih_t = (_pad_to(w_ih.reshape(4, H, I), (4, Hp, I))
              .transpose(2, 0, 1).reshape(I, 4 * Hp)).astype(compute_dtype)
    w_hh_t = (_pad_to(w_hh.reshape(4, H, H), (4, Hp, Hp))
              .transpose(2, 0, 1).reshape(Hp, 4 * Hp)).astype(compute_dtype)
    b_comb = (_pad_to((b_ih + b_hh).reshape(4, H), (4, Hp))
              .reshape(1, 4 * Hp).astype(f32))
    w_fc_t = _pad_to(w_fc, (Op, Hp)).T.astype(compute_dtype)       # (Hp, Op)
    b_fc_p = _pad_to(b_fc, (Op,)).reshape(1, Op).astype(f32)

    x_p = _pad_to(x.astype(f32), (Sp, Bp, I))

    # --- 1) hoisted input projection: pre_gates = x @ W_ih^T + b -------------
    # Stored directly in compute_dtype (halves the DMA feeding the recurrence).
    pg2d = _dense(x_p.reshape(Sp * Bp, I), w_ih_t, b_comb,
                  compute_dtype=compute_dtype, out_dtype=compute_dtype)
    pre_gates = pg2d.reshape(Sp, Bp, 4 * Hp)

    # --- 2) sequential recurrence over time ----------------------------------
    cd_size = jnp.dtype(compute_dtype).itemsize
    pg_blk_bytes = T * B_BLK * 4 * Hp * cd_size
    out_blk_bytes = T * B_BLK * Hp * cd_size
    whh_bytes = Hp * 4 * Hp * cd_size          # single-buffered (constant)
    scr_bytes = 2 * B_BLK * Hp * 4
    vmem_needed = 2 * (pg_blk_bytes + out_blk_bytes) + whh_bytes + scr_bytes
    # Explicit budget; cap at 64 MiB so the same value is valid on v7x.
    vmem_limit = int(min(max(2 * vmem_needed, 32 << 20), 64 << 20))

    unroll = True if T <= 32 else 8   # cap unroll at larger T (vreg pressure)

    h_seq = pl.pallas_call(
        functools.partial(_lstm_recurrent_kernel, hidden=Hp, unroll=unroll),
        out_shape=jax.ShapeDtypeStruct((Sp, Bp, Hp), compute_dtype),
        grid_spec=pltpu.PrefetchScalarGridSpec(
            num_scalar_prefetch=0,
            grid=(Bp // B_BLK, Sp // T),
            in_specs=[
                pl.BlockSpec((T, B_BLK, 4 * Hp), lambda b, s: (s, b, 0)),
                # W_hh's block index never changes -> single buffer (no dead
                # double-buffer VMEM at large Hp).
                pl.BlockSpec((Hp, 4 * Hp), lambda b, s: (0, 0),
                             pipeline_mode=pl.Buffered(1)),
            ],
            out_specs=pl.BlockSpec((T, B_BLK, Hp), lambda b, s: (s, b, 0)),
            scratch_shapes=[
                pltpu.VMEM((B_BLK, Hp), f32),   # h state (persists over chunks)
                pltpu.VMEM((B_BLK, Hp), f32),   # c state
            ],
        ),
        compiler_params=pltpu.CompilerParams(
            dimension_semantics=("parallel", "arbitrary"),
            vmem_limit_bytes=vmem_limit),
    )(pre_gates, w_hh_t)

    # --- 3) hoisted final Linear: y = h_seq @ W_fc^T + b_fc ------------------
    y2d = _dense(h_seq.reshape(Sp * Bp, Hp), w_fc_t, b_fc_p,
                 compute_dtype=compute_dtype, out_dtype=f32)
    y = y2d.reshape(Sp, Bp, Op)
    return y[:S, :B, :O]


def lstm_rnn_reference(x, w_ih, w_hh, b_ih, b_hh, w_fc, b_fc):
    """Pure-JAX f32 reference (same math as PyTorch LSTM + Linear)."""
    S, B, I = x.shape
    H = w_hh.shape[1]
    w_ih_t, w_hh_t = w_ih.T, w_hh.T
    b = (b_ih + b_hh)[None, :]

    def step(carry, x_t):
        h, c = carry
        gates = x_t @ w_ih_t + h @ w_hh_t + b
        i_g = jax.nn.sigmoid(gates[:, 0 * H:1 * H])
        f_g = jax.nn.sigmoid(gates[:, 1 * H:2 * H])
        g_g = jnp.tanh(gates[:, 2 * H:3 * H])
        o_g = jax.nn.sigmoid(gates[:, 3 * H:4 * H])
        c_new = f_g * c + i_g * g_g
        h_new = o_g * jnp.tanh(c_new)
        return (h_new, c_new), h_new

    init = (jnp.zeros((B, H), jnp.float32), jnp.zeros((B, H), jnp.float32))
    _, hs = lax.scan(step, init, x)                     # (S, B, H)
    return hs @ w_fc.T + b_fc[None, None, :]            # (S, B, O)


if __name__ == "__main__":
    # Small shapes consistent with the module: seq=8, batch=4,
    # input_size=16, hidden_size=32, output_size=4.
    S, B, I, H, O = 8, 4, 16, 32, 4

    key = jax.random.PRNGKey(0)
    ks = jax.random.split(key, 8)
    bound = 1.0 / jnp.sqrt(jnp.float32(H))

    def u(k, shape):
        return jax.random.uniform(k, shape, jnp.float32, -bound, bound)

    w_ih = u(ks[0], (4 * H, I))
    w_hh = u(ks[1], (4 * H, H))
    b_ih = u(ks[2], (4 * H,))
    b_hh = u(ks[3], (4 * H,))
    w_fc = u(ks[4], (O, H))
    b_fc = u(ks[5], (O,))
    x = jax.random.normal(ks[6], (S, B, I), jnp.float32)

    ref = lstm_rnn_reference(x, w_ih, w_hh, b_ih, b_hh, w_fc, b_fc)

    # f32 MXU-operand path, seq_chunk < S to exercise the h/c carry across
    # sequence chunks: must match the pure-JAX reference tightly.
    out_f32 = jax.block_until_ready(
        lstm_rnn_forward(x, w_ih, w_hh, b_ih, b_hh, w_fc, b_fc,
                         compute_dtype=jnp.float32, seq_chunk=4))
    assert out_f32.shape == (S, B, O)
    assert jnp.allclose(out_f32, ref, atol=1e-4, rtol=1e-4), "f32 mismatch"

    # bf16 MXU-operand / storage path (perf default): looser tolerance.
    out_bf16 = jax.block_until_ready(
        lstm_rnn_forward(x, w_ih, w_hh, b_ih, b_hh, w_fc, b_fc,
                         compute_dtype=jnp.bfloat16))
    assert out_bf16.shape == (S, B, O)
    assert jnp.allclose(out_bf16, ref, atol=5e-2, rtol=5e-2), "bf16 mismatch"

    # Larger batch: exercises >1 program on the parallel batch axis plus
    # batch/seq padding and multi-chunk carry.
    S2, B2 = 12, 24
    x2 = jax.random.normal(ks[7], (S2, B2, I), jnp.float32)
    ref2 = lstm_rnn_reference(x2, w_ih, w_hh, b_ih, b_hh, w_fc, b_fc)
    out2 = jax.block_until_ready(
        lstm_rnn_forward(x2, w_ih, w_hh, b_ih, b_hh, w_fc, b_fc,
                         compute_dtype=jnp.bfloat16, seq_chunk=4))
    assert out2.shape == (S2, B2, O)
    assert jnp.allclose(out2, ref2, atol=5e-2, rtol=5e-2), "batch mismatch"

    print("KERNEL_OK")
</pallas_src>

<mosaic_0001>
module attributes {stable_mosaic.version = 11 : i64} {
  func.func @_dense_kernel(%arg0: i32, %arg1: i32, %arg2: memref<64x16xf32, #tpu.memory_space<vmem>>, %arg3: memref<16x512xf32, #tpu.memory_space<vmem>>, %arg4: memref<1x512xf32, #tpu.memory_space<vmem>>, %arg5: memref<64x512xf32, #tpu.memory_space<vmem>>) attributes {dimension_semantics = [#tpu.dimension_semantics<parallel>, #tpu.dimension_semantics<parallel>], iteration_bounds = array<i64: 1, 1>, scalar_prefetch = 0 : i64, scratch_operands = 0 : i64, tpu.core_type = #tpu.core_type<tc>, window_params = [{transform_indices = @transform_0, window_bounds = array<i64: 64, 16>}, {transform_indices = @transform_1, window_bounds = array<i64: 16, 512>}, {transform_indices = @transform_2, window_bounds = array<i64: 1, 512>}, {transform_indices = @transform_3, window_bounds = array<i64: 64, 512>}]} {
    %c0 = arith.constant 0 : index
    %c0_0 = arith.constant 0 : index
    %0 = vector.load %arg2[%c0, %c0_0] : memref<64x16xf32, #tpu.memory_space<vmem>>, vector<64x16xf32>
    %c0_1 = arith.constant 0 : index
    %c0_2 = arith.constant 0 : index
    %1 = vector.load %arg3[%c0_1, %c0_2] : memref<16x512xf32, #tpu.memory_space<vmem>>, vector<16x512xf32>
    %cst = arith.constant dense<0.000000e+00> : vector<64x512xf32>
    %2 = tpu.matmul %0, %1, %cst {dimension_numbers = #tpu.dot_dimension_numbers<[1], [0], [0], [1], [0, 0, 1, 1], [], []>} : vector<64x16xf32>, vector<16x512xf32>, vector<64x512xf32> -> vector<64x512xf32>
    %c0_3 = arith.constant 0 : index
    %c0_4 = arith.constant 0 : index
    %3 = vector.load %arg4[%c0_3, %c0_4] : memref<1x512xf32, #tpu.memory_space<vmem>>, vector<1x512xf32>
    %4 = vector.broadcast %3 : vector<1x512xf32> to vector<64x512xf32>
    %5 = arith.addf %2, %4 : vector<64x512xf32>
    %c0_5 = arith.constant 0 : index
    %c0_6 = arith.constant 0 : index
    %6 = vector.load %arg5[%c0_5, %c0_6] : memref<64x512xf32, #tpu.memory_space<vmem>>, vector<64x512xf32>
    tpu.vector_store %arg5[%c0_5, %c0_6], %5 {strides = array<i32>} : memref<64x512xf32, #tpu.memory_space<vmem>>, vector<64x512xf32>,
    return
  }
  func.func @transform_0(%arg0: i32, %arg1: i32) -> (i32, i32) {
    %c0_i32 = arith.constant 0 : i32
    %c0_i32_0 = arith.constant 0 : i32
    return %arg0, %c0_i32 : i32, i32
  }
  func.func @transform_1(%arg0: i32, %arg1: i32) -> (i32, i32) {
    %c0_i32 = arith.constant 0 : i32
    %c0_i32_0 = arith.constant 0 : i32
    return %c0_i32, %arg1 : i32, i32
  }
  func.func @transform_2(%arg0: i32, %arg1: i32) -> (i32, i32) {
    %c0_i32 = arith.constant 0 : i32
    %c0_i32_0 = arith.constant 0 : i32
    return %c0_i32, %arg1 : i32, i32
  }
  func.func @transform_3(%arg0: i32, %arg1: i32) -> (i32, i32) {
    %c0_i32 = arith.constant 0 : i32
    return %arg0, %arg1 : i32, i32
  }
}

</mosaic_0001>

<bundles_post_ra>
// kernel: tpu_custom_call.1
= control target key start
LH: loop header
LB: loop body
LE: loop exit
PB: predicated region body
PF: predicated region fallthrough
CT: control target
= control target key end

     0   :  { %vm53_vm0 = vcmask 130048   ;;  %v394_v9 = vmov 0.0   ;;  %s528_s0 = inlined_call_operand.vmem [shape: f32[64,16], index: 0, kind: input, shape index: {}]   ;;  %s529_s1 = inlined_call_operand.vmem [shape: f32[16,512], index: 1, kind: input, shape index: {}]   ;;  %s530_s2 = inlined_call_operand.vmem [shape: f32[1,512], index: 2, kind: input, shape index: {}]   ;;  %s531_s3 = inlined_call_operand.hbm [shape: f32[64,512], index: 3, kind: output, shape index: {}]  }
   0x1   :  { %v28_v0 = vld [vmem:[%s529_s1 + $0x28] sm:$0xff]  ;;  %v30_v1 = vld [vmem:[%s529_s1 + $0x38] sm:$0xff]  ;;  %v27_v2 = vld [vmem:[%s529_s1 + $0x20] sm:$0xff]  ;;  %142 = vmatprep.mubr.f32.mxu0 %v394_v9  ;;  %255 = vmatprep.mubr.f32.mxu1 %v394_v9 }
   0x2   :  { %106 = vmatprep.subr.mxu0 %v28_v0  ;;  %219 = vmatprep.subr.mxu1 %v30_v1  ;;  %v29_v3 = vld [vmem:[%s529_s1 + $0x30] sm:$0xff]  ;;  %v24_v4 = vld [vmem:[%s529_s1 + $0x8] sm:$0xff]  ;;  %v26_v5 = vld [vmem:[%s529_s1 + $0x18] sm:$0xff] }
   0x3   :  { %107 = vmatpush1.msra.mxu0 %v27_v2  ;;  %220 = vmatpush1.msra.mxu1 %v29_v3  ;;  %v23_v6 = vld [vmem:[%s529_s1] sm:$0xff]  ;;  %v25_v7 = vld [vmem:[%s529_s1 + $0x10] sm:$0xff] }
   0x4   :  { %108 = vmatprep.subr.mxu0 %v24_v4  ;;  %221 = vmatprep.subr.mxu1 %v26_v5  ;;  %v15_v8 = vld [vmem:[%s528_s0] sm:$0xff] }
   0x5   :  { %109 = vmatpush1.msra.mxu0 %v23_v6  ;;  %222 = vmatpush1.msra.mxu1 %v25_v7 }
   0x6   :  { %8 = vsyncpa [#allocation3], 0  ;;  %352 = vmatmul.mubr.msk.f32.vlgmr.msra.gmra.mxu0 %vm53_vm0, %v15_v8  ;;  %360 = vmatmul.mubr.msk.f32.vlgmr.msra.gmra.mxu1 %vm53_vm0, %v15_v8  ;;  %v16_v10 = vld [vmem:[%s528_s0 + $0x8] sm:$0xff]  ;;  %v17_v11 = vld [vmem:[%s528_s0 + $0x10] sm:$0xff]  ;;  %v33_v17 = vlaneseq }
   0x7   :  { %148 = vmatprep.mubr.f32.mxu0 %v394_v9  ;;  %261 = vmatprep.mubr.f32.mxu1 %v394_v9  ;;  %v18_v12 = vld [vmem:[%s528_s0 + $0x18] sm:$0xff]  ;;  %v19_v13 = vld [vmem:[%s528_s0 + $0x20] sm:$0xff]  ;;  %v20_v14 = vld [vmem:[%s528_s0 + $0x28] sm:$0xff] }
   0x8   :  { %v21_v15 = vld [vmem:[%s528_s0 + $0x30] sm:$0xff]  ;;  %v22_v16 = vld [vmem:[%s528_s0 + $0x38] sm:$0xff]  ;;  %v34_v18 = vshrl.u32 %v33_v17, 7  ;;  %v31_v21 = vld [vmem:[%s530_s2] sm:$0xf]  ;;  %s395_s0 = smov [#allocation2]  }
   0x9   :  { %s341_s2 = sshll.u32 %s395_s0, 4  ;;  %s342_s2 = int_to_ptr.vmem [resolvable:$true] %s341_s2 }
   0xa   :  { %353 = vmatmul.mubr.msk.f32.gmra.mxu0 %vm53_vm0, %v16_v10  ;;  %361 = vmatmul.mubr.msk.f32.gmra.mxu1 %vm53_vm0, %v16_v10  ;;  %v35_v19 = vsub.s32 0, %v34_v18  ;;  %v43_v20 = vsub.s32 2, %v34_v18  ;;  %v39_v22 = vsub.s32 1, %v34_v18  ;;  %v47_v23 = vsub.s32 3, %v34_v18  ;;  %s372_s18 = scalar_lea.vmem %s342_s2, 4096  ;;  %p377_p1 = scmp.lt.s32.totalorder %s342_s2, %s342_s2 }
   0xb   :  { %154 = vmatprep.mubr.f32.mxu0 %v394_v9  ;;  %267 = vmatprep.mubr.f32.mxu1 %v394_v9  ;;  %p373_p0 = scmp.ne.s32.totalorder %s342_s2, %s372_s18  ;;  %p378_p2 = scmp.lt.s32.totalorder %s372_s18, %s372_s18 }
   0xc   :  { %v485_v24 = vrot.slane %v31_v21, %v35_v19  ;;  %v487_v25 = vrot.slane %v31_v21, %v43_v20  ;;  %v489_v26 = vrot.slane %v31_v21, %v39_v22  ;;  %v491_v27 = vrot.slane %v31_v21, %v47_v23 }
   0xd   :  { %p379_p3 = por %p378_p2, %p377_p1 }
   0xe   :  { %354 = vmatmul.mubr.msk.f32.gmra.mxu0 %vm53_vm0, %v17_v11  ;;  %362 = vmatmul.mubr.msk.f32.gmra.mxu1 %vm53_vm0, %v17_v11 }
   0xf   :  { %160 = vmatprep.mubr.f32.mxu0 %v394_v9  ;;  %273 = vmatprep.mubr.f32.mxu1 %v394_v9  ;;  %p380_p4 = pnand %p379_p3, %p373_p0 }
  0x12   :  { %355 = vmatmul.mubr.msk.f32.gmra.mxu0 %vm53_vm0, %v18_v12  ;;  %363 = vmatmul.mubr.msk.f32.gmra.mxu1 %vm53_vm0, %v18_v12 }
  0x13   :  { %166 = vmatprep.mubr.f32.mxu0 %v394_v9  ;;  %279 = vmatprep.mubr.f32.mxu1 %v394_v9 }
  0x16   :  { %356 = vmatmul.mubr.msk.f32.gmra.mxu0 %vm53_vm0, %v19_v13  ;;  %364 = vmatmul.mubr.msk.f32.gmra.mxu1 %vm53_vm0, %v19_v13 }
  0x17   :  { %172 = vmatprep.mubr.f32.mxu0 %v394_v9  ;;  %285 = vmatprep.mubr.f32.mxu1 %v394_v9 }
  0x1a   :  { %357 = vmatmul.mubr.msk.f32.gmra.mxu0 %vm53_vm0, %v20_v14  ;;  %365 = vmatmul.mubr.msk.f32.gmra.mxu1 %vm53_vm0, %v20_v14 }
  0x1b   :  { %178 = vmatprep.mubr.f32.mxu0 %v394_v9  ;;  %291 = vmatprep.mubr.f32.mxu1 %v394_v9 }
  0x1e   :  { %358 = vmatmul.mubr.msk.f32.gmra.mxu0 %vm53_vm0, %v21_v15  ;;  %366 = vmatmul.mubr.msk.f32.gmra.mxu1 %vm53_vm0, %v21_v15 }
  0x1f   :  { %184 = vmatprep.mubr.f32.mxu0 %v394_v9  ;;  %297 = vmatprep.mubr.f32.mxu1 %v394_v9 }
  0x22   :  { %359 = vmatmul.mubr.msk.f32.gmra.mxu0 %vm53_vm0, %v22_v16  ;;  %367 = vmatmul.mubr.msk.f32.gmra.mxu1 %vm53_vm0, %v22_v16 }
  0xc6   :  { %v144_v28 = vpop.f32.mrf.mxu0  ;;  %v257_v29 = vpop.f32.mrf.mxu1 }
  0xc7   :  { %v145_v30 = vadd.f32 %v144_v28, %v485_v24  ;;  %v258_v31 = vadd.f32 %v257_v29, %v487_v25 }
  0xc8   :  { %v146_v32 = vpop.f32.mrf.mxu0  ;;  %v259_v33 = vpop.f32.mrf.mxu1 }
  0xc9   :  { %304 = vst [vmem:[#allocation2] sm:$0xff] %v145_v30  ;;  %306 = vst [vmem:[#allocation2 + $0x10] sm:$0xff] %v258_v31  ;;  %v147_v34 = vadd.f32 %v146_v32, %v489_v26  ;;  %v260_v35 = vadd.f32 %v259_v33, %v491_v27 }
  0xca   :  { %v150_v36 = vpop.f32.mrf.mxu0  ;;  %v263_v37 = vpop.f32.mrf.mxu1 }
  0xcb   :  { %305 = vst [vmem:[#allocation2 + $0x8] sm:$0xff] %v147_v34  ;;  %307 = vst [vmem:[#allocation2 + $0x18] sm:$0xff] %v260_v35  ;;  %v151_v38 = vadd.f32 %v150_v36, %v485_v24  ;;  %v264_v39 = vadd.f32 %v263_v37, %v487_v25 }
  0xcc   :  { %v152_v40 = vpop.f32.mrf.mxu0  ;;  %v265_v41 = vpop.f32.mrf.mxu1 }
  0xcd   :  { %308 = vst [vmem:[#allocation2 + $0x20] sm:$0xff] %v151_v38  ;;  %310 = vst [vmem:[#allocation2 + $0x30] sm:$0xff] %v264_v39  ;;  %v153_v42 = vadd.f32 %v152_v40, %v489_v26  ;;  %v266_v43 = vadd.f32 %v265_v41, %v491_v27 }
  0xce   :  { %v156_v44 = vpop.f32.mrf.mxu0  ;;  %v269_v45 = vpop.f32.mrf.mxu1 }
  0xcf   :  { %309 = vst [vmem:[#allocation2 + $0x28] sm:$0xff] %v153_v42  ;;  %311 = vst [vmem:[#allocation2 + $0x38] sm:$0xff] %v266_v43  ;;  %v157_v46 = vadd.f32 %v156_v44, %v485_v24  ;;  %v270_v47 = vadd.f32 %v269_v45, %v487_v25 }
  0xd0   :  { %v158_v48 = vpop.f32.mrf.mxu0  ;;  %v271_v49 = vpop.f32.mrf.mxu1 }
  0xd1   :  { %312 = vst [vmem:[#allocation2 + $0x40] sm:$0xff] %v157_v46  ;;  %314 = vst [vmem:[#allocation2 + $0x50] sm:$0xff] %v270_v47  ;;  %v159_v50 = vadd.f32 %v158_v48, %v489_v26  ;;  %v272_v51 = vadd.f32 %v271_v49, %v491_v27 }
  0xd2   :  { %v162_v52 = vpop.f32.mrf.mxu0  ;;  %v275_v53 = vpop.f32.mrf.mxu1 }
  0xd3   :  { %313 = vst [vmem:[#allocation2 + $0x48] sm:$0xff] %v159_v50  ;;  %315 = vst [vmem:[#allocation2 + $0x58] sm:$0xff] %v272_v51  ;;  %v163_v54 = vadd.f32 %v162_v52, %v485_v24  ;;  %v276_v55 = vadd.f32 %v275_v53, %v487_v25 }
  0xd4   :  { %v164_v56 = vpop.f32.mrf.mxu0  ;;  %v277_v57 = vpop.f32.mrf.mxu1 }
  0xd5   :  { %316 = vst [vmem:[#allocation2 + $0x60] sm:$0xff] %v163_v54  ;;  %318 = vst [vmem:[#allocation2 + $0x70] sm:$0xff] %v276_v55  ;;  %v165_v58 = vadd.f32 %v164_v56, %v489_v26  ;;  %v278_v59 = vadd.f32 %v277_v57, %v491_v27 }
  0xd6   :  { %v168_v60 = vpop.f32.mrf.mxu0  ;;  %v281_v61 = vpop.f32.mrf.mxu1 }
  0xd7   :  { %317 = vst [vmem:[#allocation2 + $0x68] sm:$0xff] %v165_v58  ;;  %319 = vst [vmem:[#allocation2 + $0x78] sm:$0xff] %v278_v59  ;;  %v169_v62 = vadd.f32 %v168_v60, %v485_v24  ;;  %v282_v63 = vadd.f32 %v281_v61, %v487_v25 }
  0xd8   :  { %v170_v0 = vpop.f32.mrf.mxu0  ;;  %v283_v1 = vpop.f32.mrf.mxu1 }
  0xd9   :  { %320 = vst [vmem:[#allocation2 + $0x80] sm:$0xff] %v169_v62  ;;  %322 = vst [vmem:[#allocation2 + $0x90] sm:$0xff] %v282_v63  ;;  %v171_v2 = vadd.f32 %v170_v0, %v489_v26  ;;  %v284_v3 = vadd.f32 %v283_v1, %v491_v27 }
  0xda   :  { %v174_v4 = vpop.f32.mrf.mxu0  ;;  %v287_v5 = vpop.f32.mrf.mxu1 }
  0xdb   :  { %321 = vst [vmem:[#allocation2 + $0x88] sm:$0xff] %v171_v2  ;;  %323 = vst [vmem:[#allocation2 + $0x98] sm:$0xff] %v284_v3  ;;  %v175_v6 = vadd.f32 %v174_v4, %v485_v24  ;;  %v288_v7 = vadd.f32 %v287_v5, %v487_v25 }
  0xdc   :  { %v176_v8 = vpop.f32.mrf.mxu0  ;;  %v289_v9 = vpop.f32.mrf.mxu1 }
  0xdd   :  { %324 = vst [vmem:[#allocation2 + $0xa0] sm:$0xff] %v175_v6  ;;  %326 = vst [vmem:[#allocation2 + $0xb0] sm:$0xff] %v288_v7  ;;  %v177_v10 = vadd.f32 %v176_v8, %v489_v26  ;;  %v290_v11 = vadd.f32 %v289_v9, %v491_v27 }
  0xde   :  { %v180_v12 = vpop.f32.mrf.mxu0  ;;  %v293_v13 = vpop.f32.mrf.mxu1 }
  0xdf   :  { %325 = vst [vmem:[#allocation2 + $0xa8] sm:$0xff] %v177_v10  ;;  %327 = vst [vmem:[#allocation2 + $0xb8] sm:$0xff] %v290_v11  ;;  %v181_v14 = vadd.f32 %v180_v12, %v485_v24  ;;  %v294_v15 = vadd.f32 %v293_v13, %v487_v25 }
  0xe0   :  { %v182_v16 = vpop.f32.mrf.mxu0  ;;  %v295_v17 = vpop.f32.mrf.mxu1 }
  0xe1   :  { %328 = vst [vmem:[#allocation2 + $0xc0] sm:$0xff] %v181_v14  ;;  %330 = vst [vmem:[#allocation2 + $0xd0] sm:$0xff] %v294_v15  ;;  %v183_v18 = vadd.f32 %v182_v16, %v489_v26  ;;  %v296_v19 = vadd.f32 %v295_v17, %v491_v27 }
  0xe2   :  { %v186_v20 = vpop.f32.mrf.mxu0  ;;  %v299_v21 = vpop.f32.mrf.mxu1 }
  0xe3   :  { %329 = vst [vmem:[#allocation2 + $0xc8] sm:$0xff] %v183_v18  ;;  %331 = vst [vmem:[#allocation2 + $0xd8] sm:$0xff] %v296_v19  ;;  %v187_v22 = vadd.f32 %v186_v20, %v485_v24  ;;  %v300_v23 = vadd.f32 %v299_v21, %v487_v25 }
  0xe4   :  { %v188_v28 = vpop.f32.mrf.mxu0  ;;  %v301_v29 = vpop.f32.mrf.mxu1 }
  0xe5   :  { %332 = vst [vmem:[#allocation2 + $0xe0] sm:$0xff] %v187_v22  ;;  %334 = vst [vmem:[#allocation2 + $0xf0] sm:$0xff] %v300_v23  ;;  %v189_v30 = vadd.f32 %v188_v28, %v489_v26  ;;  %v302_v31 = vadd.f32 %v301_v29, %v491_v27 }
  0xe7   :  { %333 = vst [vmem:[#allocation2 + $0xe8] sm:$0xff] %v189_v30  ;;  %335 = vst [vmem:[#allocation2 + $0xf8] sm:$0xff] %v302_v31 }
  0xe8   :  { %383 = shalt.err (!%p380_p4)
}
  0xe9   :  { %s396_s19 = smov 512   ;;  %s397_s20 = smov 32  }
  0xea   :  { %347 = dma.vmem_to_hbm [thread:$0]  %s342_s2, 4096, %s531_s3, [#allocation3], %s396_s19, %s396_s19, %s397_s20  }
  0xeb   :  { %392 = dma.done.wait [#allocation3], 4096  }
  0xec   :  { %393 = vsyncadd [#allocation3], 4294963200 }
  0xed   :  { %351 = vsyncpa [#allocation3], 1 }

</bundles_post_ra>
